<compile_context>
chip_gen: v7x
topology: tpu7x:2x2x1
jax: 0.10.0
libtpu: 0.0.40
codegen_flags: <defaults>
</compile_context>

<pallas_src>
import functools

import jax
import jax.numpy as jnp
from jax.experimental import pallas as pl
from jax.experimental.pallas import tpu as pltpu

K = 3
CONFIG = {"batch_size": 10, "d_model": 32, "n_heads": 8, "context_window": K ** 2}

LANE = 128            # TPU vreg lane width
MAX_BATCH_BLOCK = 8   # f32 sublane depth of one vreg


def rmsnorm_kernel(x_ref, scale_ref, o_ref, *, inv_n):
    """One chunk of batch rows; features flattened into the lane-dense last dim.

    x_ref:     (BB, Lp)  input rows, Lp = S*D padded up to a multiple of 128
    scale_ref: (1,  Lp)  flattened f32 scale (same resident block every step)
    o_ref:     (BB, Lp)
    """
    x = x_ref[...].astype(jnp.float32)
    # Per-batch-row sum of squares; zero padding lanes contribute nothing.
    sumsq = jnp.sum(x * x, axis=-1, keepdims=True)          # (BB, 1)
    # 1 / ff_rms == rsqrt(mean(x^2)); rsqrt runs on the EUP slot (nearly free).
    # NOTE: no eps, matching the reference forward() exactly.
    inv = jax.lax.rsqrt(sumsq * inv_n)                      # (BB, 1)
    o_ref[...] = ((x * inv) * scale_ref[...]).astype(o_ref.dtype)


def rmsnorm(x, scale):
    """x: (B, S, D); scale: (layer_shape_0, D) with layer_shape_0 >= S."""
    B, S, D = x.shape
    n = S * D
    lp = pl.cdiv(n, LANE) * LANE                    # lane-dense feature length
    bb = MAX_BATCH_BLOCK if B >= MAX_BATCH_BLOCK else B

    # --- wrapper-side layout plumbing (plain JAX glue, cheap reshapes) ---
    xf = x.reshape(B, n)
    sf = scale[:S, :].astype(jnp.float32).reshape(1, n)
    if lp != n:
        xf = jnp.pad(xf, ((0, 0), (0, lp - n)))
        sf = jnp.pad(sf, ((0, 0), (0, lp - n)))

    itemsize = jnp.dtype(x.dtype).itemsize
    out = pl.pallas_call(
        functools.partial(rmsnorm_kernel, inv_n=1.0 / float(n)),
        out_shape=jax.ShapeDtypeStruct((B, lp), x.dtype),
        grid=(pl.cdiv(B, bb),),
        in_specs=[
            pl.BlockSpec((bb, lp), lambda i: (i, 0)),   # chunk of batch rows
            pl.BlockSpec((1, lp), lambda i: (0, 0)),    # scale, resident block
        ],
        out_specs=pl.BlockSpec((bb, lp), lambda i: (i, 0)),
        compiler_params=pltpu.CompilerParams(
            dimension_semantics=("parallel",)),          # shard chunks on v7x
        cost_estimate=pl.CostEstimate(
            flops=3 * B * n,
            transcendentals=B,
            bytes_accessed=(2 * B * n + n) * itemsize),
    )(xf, sf)

    # TODO(synk): at production sizes (S*D too large for one VMEM block, esp.
    # v7x's 64 MiB), tile the feature axis with an "arbitrary" reduction grid
    # dim and pl.when init/finalize instead of a whole-row block.
    return out[:, :n].reshape(B, S, D)


def rmsnorm_ref(x, scale):
    B, S, D = x.shape
    xf = x.astype(jnp.float32)
    ff_rms = jnp.sqrt(jnp.sum(xf * xf, axis=(1, 2))) * (S * D) ** -0.5
    return scale[None, :S, :] * (x / ff_rms[:, None, None])


if __name__ == "__main__":
    S = CONFIG["context_window"]   # 9
    D = CONFIG["d_model"]          # 32
    B = 2

    key = jax.random.PRNGKey(0)
    x = jax.random.normal(key, (B, S, D), dtype=jnp.float32)

    # Deterministic parameter init, matching nn.Parameter(torch.ones(layer_shape))
    # with layer_shape = (context_window, d_model).
    scale = jnp.ones((S, D), dtype=jnp.float32)

    out = rmsnorm(x, scale)
    out = jax.block_until_ready(out)

    ref = rmsnorm_ref(x, scale)
    assert out.shape == (B, S, D)
    assert jnp.allclose(out, ref, atol=1e-5, rtol=1e-5)

    print("KERNEL_OK")
</pallas_src>

<mosaic_0001>
module attributes {stable_mosaic.version = 11 : i64} {
  func.func @rmsnorm_kernel(%arg0: i32, %arg1: memref<2x384xf32, #tpu.memory_space<vmem>>, %arg2: memref<1x384xf32, #tpu.memory_space<vmem>>, %arg3: memref<2x384xf32, #tpu.memory_space<vmem>>) attributes {dimension_semantics = [#tpu.dimension_semantics<parallel>], iteration_bounds = array<i64: 1>, scalar_prefetch = 0 : i64, scratch_operands = 0 : i64, tpu.core_type = #tpu.core_type<tc>, window_params = [{transform_indices = @transform_0, window_bounds = array<i64: 2, 384>}, {pipeline_mode = #tpu.pipeline_mode<synchronous>, transform_indices = @transform_1, window_bounds = array<i64: 1, 384>}, {transform_indices = @transform_2, window_bounds = array<i64: 2, 384>}]} {
    %c0 = arith.constant 0 : index
    %c0_0 = arith.constant 0 : index
    %0 = vector.load %arg1[%c0, %c0_0] : memref<2x384xf32, #tpu.memory_space<vmem>>, vector<2x384xf32>
    %1 = arith.mulf %0, %0 : vector<2x384xf32>
    %cst = arith.constant dense<0.000000e+00> : vector<2xf32>
    %2 = vector.multi_reduction <add>, %1, %cst [1] : vector<2x384xf32> to vector<2xf32>
    %3 = vector.shape_cast %2 : vector<2xf32> to vector<2x1xf32>
    %cst_1 = arith.constant 0.00347222225 : f32
    %4 = vector.broadcast %cst_1 : f32 to vector<2x1xf32>
    %5 = arith.mulf %3, %4 : vector<2x1xf32>
    %6 = math.rsqrt %5 : vector<2x1xf32>
    %7 = vector.broadcast %6 : vector<2x1xf32> to vector<2x384xf32>
    %8 = arith.mulf %0, %7 : vector<2x384xf32>
    %c0_2 = arith.constant 0 : index
    %c0_3 = arith.constant 0 : index
    %9 = vector.load %arg2[%c0_2, %c0_3] : memref<1x384xf32, #tpu.memory_space<vmem>>, vector<1x384xf32>
    %10 = vector.broadcast %9 : vector<1x384xf32> to vector<2x384xf32>
    %11 = arith.mulf %8, %10 : vector<2x384xf32>
    %c0_4 = arith.constant 0 : index
    %c0_5 = arith.constant 0 : index
    %12 = vector.load %arg3[%c0_4, %c0_5] : memref<2x384xf32, #tpu.memory_space<vmem>>, vector<2x384xf32>
    tpu.vector_store %arg3[%c0_4, %c0_5], %11 {strides = array<i32>} : memref<2x384xf32, #tpu.memory_space<vmem>>, vector<2x384xf32>,
    return
  }
  func.func @transform_0(%arg0: i32) -> (i32, i32) {
    %c0_i32 = arith.constant 0 : i32
    %c0_i32_0 = arith.constant 0 : i32
    return %arg0, %c0_i32 : i32, i32
  }
  func.func @transform_1(%arg0: i32) -> (i32, i32) {
    %c0_i32 = arith.constant 0 : i32
    %c0_i32_0 = arith.constant 0 : i32
    %c0_i32_1 = arith.constant 0 : i32
    return %c0_i32, %c0_i32_0 : i32, i32
  }
  func.func @transform_2(%arg0: i32) -> (i32, i32) {
    %c0_i32 = arith.constant 0 : i32
    %c0_i32_0 = arith.constant 0 : i32
    return %arg0, %c0_i32 : i32, i32
  }
}

</mosaic_0001>

<bundles_post_ra>
// kernel: tpu_custom_call.1
= control target key start
LH: loop header
LB: loop body
LE: loop exit
PB: predicated region body
PF: predicated region fallthrough
CT: control target
= control target key end

     0   :  { %7 = vsyncpa [#allocation3], 0  ;;  %s214_s0 = inlined_call_operand.hbm [shape: f32[2,384], index: 0, kind: input, shape index: {}]   ;;  %s215_s1 = inlined_call_operand.vmem [shape: f32[1,384], index: 1, kind: input, shape index: {}]   ;;  %s216_s2 = inlined_call_operand.hbm [shape: f32[2,384], index: 2, kind: output, shape index: {}]  }
   0x1   :  { %8 = vsyncpa [#allocation4], 0  ;;  %s168_s9 = smov [#allocation2]   ;;  %s120_s13 = scalar_lea.hbm %s214_s0, 96 }
   0x2   :  { %s15_s10 = sshll.u32 %s168_s9, 4  ;;  %p121_p0 = scmp.ne.s32.totalorder %s214_s0, %s120_s13  ;;  %s16_s10 = int_to_ptr.vmem [resolvable:$true] %s15_s10 }
   0x3   :  { %p124_p1 = scmp.lt.u32.totalorder %s120_s13, %s214_s0 }
   0x5   :  { %p126_p2 = pnand %p124_p1, %p121_p0 }
   0x7   :  { %129 = shalt.err (!%p126_p2)
}
   0x8   :  { %s130_s18 = scalar_lea.vmem %s16_s10, 96  ;;  %p135_p4 = scmp.lt.s32.totalorder %s16_s10, %s16_s10 }
   0x9   :  { %p131_p3 = scmp.ne.s32.totalorder %s16_s10, %s130_s18  ;;  %p136_p5 = scmp.lt.s32.totalorder %s130_s18, %s130_s18 }
   0xb   :  { %p137_p6 = por %p136_p5, %p135_p4 }
   0xd   :  { %p138_p7 = pnand %p137_p6, %p131_p3 }
   0xf   :  { %141 = shalt.err (!%p138_p7)
}
  0x10   :  { %18 = dma.hbm_to_vmem [thread:$0]  %s214_s0, 96, %s16_s10, [#allocation3]  }
  0x11   :  { %164 = dma.done.wait [#allocation3], 96  }
  0x12   :  { %165 = vsyncadd [#allocation3], 4294967200  ;;  %v31_v0 = vlaneseq  ;;  %v169_v1 = vmov 1983009808   ;;  %v24_v6 = vld [vmem:[#allocation2] sm:$0x3f] }
  0x13   :  { %v29_v2 = vunpack.c.l.s4 %v169_v1  ;;  %v25_v7 = vmul.f32 %v24_v6, %v24_v6  ;;  %vm46_vm0 = vcmask 1041408   ;;  %v66_v19 = vld [vmem:[%s215_s1] sm:$0x7]  ;;  %v170_v30 = vmov 269488144   ;;  %s171_s22 = smov [#allocation5]  }
  0x14   :  { %v32_v3 = vshrl.u32 %v31_v0, 7  ;;  %v58_v31 = vunpack.c.l.s4 %v170_v30  ;;  %s105_s23 = sshll.u32 %s171_s22, 4  ;;  %s106_s23 = int_to_ptr.vmem [resolvable:$true] %s105_s23 }
  0x15   :  { %v30_v4 = vunpack.c.0.s8 %v29_v2  ;;  %v27_v8 = vcombine.high %v25_v7, %v25_v7  ;;  %s142_s1 = scalar_lea.vmem %s106_s23, 96  ;;  %p147_p9 = scmp.lt.s32.totalorder %s106_s23, %s106_s23 }
  0x16   :  { %v70_v17 = vsub.s32 0, %v32_v3  ;;  %v74_v18 = vsub.s32 1, %v32_v3  ;;  %v78_v22 = vsub.s32 2, %v32_v3  ;;  %v59_v32 = vunpack.c.0.s8 %v58_v31  ;;  %p143_p8 = scmp.ne.s32.totalorder %s106_s23, %s142_s1  ;;  %p148_p10 = scmp.lt.s32.totalorder %s142_s1, %s142_s1 }
  0x17   :  { %v33_v5 = vsub.s32 %v30_v4, %v32_v3 }
  0x18   :  { %v71_v20 = vrot.slane %v66_v19, %v70_v17  ;;  %v75_v21 = vrot.slane %v66_v19, %v74_v18  ;;  %v79_v23 = vrot.slane %v66_v19, %v78_v22  ;;  %v62_v33 = vsub.s32 %v59_v32, %v32_v3  ;;  %p149_p11 = por %p148_p10, %p147_p9 }
  0x19   :  { %v34_v9 = vrot.slane %v25_v7, %v33_v5  ;;  %v41_v10 = vrot.slane %v27_v8, %v33_v5 }
  0x1a   :  { %v80_v24 = vcombine.low %v71_v20, %v75_v21  ;;  %v94_v26 = vrot.slane %v79_v23, %v33_v5  ;;  %p150_p12 = pnand %p149_p11, %p143_p8 }
  0x1b   :  { %v42_v11 = vcombine.high %v34_v9, %v34_v9  ;;  %v47_v12 = vsel %vm46_vm0, %v34_v9, 0.0  ;;  %v50_v14 = vsel %vm46_vm0, %v41_v10, 0.0 }
  0x1c   :  { %v87_v25 = vrot.slane %v80_v24, %v33_v5 }
  0x1d   :  { %v48_v13 = vsel %vm46_vm0, %v42_v11, 0.0 }
  0x1e   :  { %v49_v15 = vadd.f32 %v48_v13, %v47_v12  ;;  %v95_v27 = vcombine.low %v87_v25, %v94_v26 }
  0x20   :  { %v51_v16 = vadd.f32 %v50_v14, %v49_v15 }
  0x22   :  { %52 = vadd.xlane.f32.xlu0 %v51_v16 }
  0xaf   :  { %v53_v28 = vpop.xlane.xlu0 %52 }
  0xb0   :  { %v54_v29 = vmul.f32 0.0034722222, %v53_v28 }
  0xb2   :  { %118 = vrsqrt.f32 %v54_v29 }
  0xbc   :  { %v119_v34 = vpop.eup %118 }
  0xbd   :  { %v63_v35 = vrot.slane %v119_v34, %v62_v33 }
  0xbf   :  { %v65_v36 = vmul.f32 %v63_v35, %v24_v6 }
  0xc1   :  { %v97_v37 = vmul.f32 %v95_v27, %v65_v36 }
  0xc3   :  { %98 = vst [vmem:[#allocation5] sm:$0x3f] %v97_v37 }
  0xc4   :  { %153 = shalt.err (!%p150_p12)
}
  0xc5   :  { %s154_s26 = scalar_lea.hbm %s216_s2, 96 }
  0xc6   :  { %p155_p13 = scmp.ne.s32.totalorder %s216_s2, %s154_s26  ;;  %p158_p0 = scmp.lt.u32.totalorder %s154_s26, %s216_s2 }
  0xc8   :  { %p160_p1 = pnand %p158_p0, %p155_p13 }
  0xca   :  { %163 = shalt.err (!%p160_p1)
}
  0xcb   :  { %108 = dma.vmem_to_hbm [thread:$0]  %s106_s23, 96, %s216_s2, [#allocation4]  }
  0xcc   :  { %166 = dma.done.wait [#allocation4], 96  }
  0xcd   :  { %167 = vsyncadd [#allocation4], 4294967200 }
  0xce   :  { %112 = vsyncpa [#allocation3], 1 }
  0xcf   :  { %113 = vsyncpa [#allocation4], 1 }

</bundles_post_ra>
